<compile_context>
chip_gen: v7x
topology: tpu7x:2x2x1
jax: 0.10.0
libtpu: 0.0.40
codegen_flags: <defaults>
</compile_context>

<pallas_src>
import jax
import jax.numpy as jnp
from jax.experimental import pallas as pl
from jax.experimental.pallas import tpu as pltpu


def _add_pos_kernel(x_ref, e_ref, o_ref):
    # x_ref / e_ref / o_ref: (1, Rt, C) VMEM tiles (or (1, H, W, D) in the
    # rare fallback path). One broadcast-free VPU add pass.
    o_ref[...] = x_ref[...] + e_ref[...]


def _resize_pos_embed(embed, spatial):
    """Bicubic resize of the (1, Hs, Ws, D) table to (1, H, W, D).

    Parameter glue, not the hot path. If the input spatial size is fixed per
    model instance, precompute/cache this once outside the jitted forward so
    the resize does not run per call.
    """
    # TODO(synk): jax.image.resize 'bicubic' uses Keys a=-0.5; PyTorch
    # F.interpolate bicubic uses a=-0.75, so interpolated values differ slightly.
    D = embed.shape[-1]
    e = jnp.transpose(embed, (0, 3, 1, 2))                     # (1, D, Hs, Ws)
    e = jax.image.resize(e, (1, D) + tuple(spatial), method="bicubic")
    return jnp.transpose(e, (0, 2, 3, 1))                      # (1, H, W, D)


def _choose_tiling(L, itemsize, target_bytes=2 * 1024 * 1024):
    """Pick (C, R, Rt): lane-dense column width C (multiple of 128 dividing L),
    R = L // C rows per image, Rt rows per block (~target_bytes of x)."""
    if L % 128 != 0:
        return None
    for C in (1024, 512, 256, 128):
        if L % C == 0:
            break
    R = L // C
    sub = {4: 8, 2: 16, 1: 32}.get(itemsize, 8)    # sublane tiling per dtype
    target_rows = max(1, target_bytes // (C * itemsize))
    if target_rows >= R:
        Rt = R                                     # full extent: always legal
    else:
        Rt = max(sub, (target_rows // sub) * sub)  # multiple of sublane tiling
        if Rt >= R:
            Rt = R
    return C, R, Rt


def vit_pos_embed_2d(x, embed, *, allow_interpolation=True):
    """x: (B, H, W, D); embed: (1, Hs, Ws, D). Returns x + embed (broadcast)."""
    assert x.ndim == 4 and embed.ndim == 4 and embed.shape[0] == 1
    B, H, W, D = x.shape

    if x.shape[1:] != embed.shape[1:]:
        assert allow_interpolation
        embed = _resize_pos_embed(embed, (H, W))

    # Keep I/O (and the add) in x.dtype: the kernel is HBM-bandwidth bound, so
    # upcasting bf16 inputs to f32 would double the bytes moved.
    # TODO(synk): PyTorch type promotion would compute bf16 + f32 in f32.
    embed = embed.astype(x.dtype)

    L = H * W * D
    itemsize = jnp.dtype(x.dtype).itemsize
    tiling = _choose_tiling(L, itemsize)

    if tiling is None:
        # Rare fallback (H*W*D not a multiple of 128): one image per grid step,
        # full-extent last-two block dims (always legal).
        return pl.pallas_call(
            _add_pos_kernel,
            out_shape=jax.ShapeDtypeStruct((B, H, W, D), x.dtype),
            grid=(B,),
            in_specs=[
                pl.BlockSpec((1, H, W, D), lambda b: (b, 0, 0, 0)),
                pl.BlockSpec((1, H, W, D), lambda b: (0, 0, 0, 0)),
            ],
            out_specs=pl.BlockSpec((1, H, W, D), lambda b: (b, 0, 0, 0)),
            compiler_params=pltpu.CompilerParams(
                dimension_semantics=("parallel",)),
        )(x, embed)

    C, R, Rt = tiling
    x3 = x.reshape(B, R, C)            # free bitcast view of (B, H, W, D)
    e3 = embed.reshape(1, R, C)

    out3 = pl.pallas_call(
        _add_pos_kernel,
        out_shape=jax.ShapeDtypeStruct((B, R, C), x.dtype),
        grid=(pl.cdiv(R, Rt), B),      # batch innermost -> embed tile resident
        in_specs=[
            pl.BlockSpec((1, Rt, C), lambda r, b: (b, r, 0)),
            pl.BlockSpec((1, Rt, C), lambda r, b: (0, r, 0)),
        ],
        out_specs=pl.BlockSpec((1, Rt, C), lambda r, b: (b, r, 0)),
        compiler_params=pltpu.CompilerParams(
            dimension_semantics=("parallel", "parallel")),
    )(x3, e3)
    return out3.reshape(B, H, W, D)


def init_vit_pos_embed_2d(key, seqlens, dim, std=0.02):
    """Matches nn.init.trunc_normal_(embed, std=0.02): normal truncated to
    [-2*std, 2*std]."""
    shape = (1, *seqlens, dim)
    u = jax.random.truncated_normal(key, -2.0, 2.0, shape, dtype=jnp.float32)
    return u * std


if __name__ == "__main__":
    B, H, W, D = 2, 16, 16, 32
    seqlens = (H, W)

    key = jax.random.PRNGKey(0)
    kx, ke = jax.random.split(key)

    x = jax.random.normal(kx, (B, H, W, D), dtype=jnp.float32)
    embed = init_vit_pos_embed_2d(ke, seqlens, D)

    # Matching-shape path (no interpolation), hot path in Pallas.
    out = jax.block_until_ready(vit_pos_embed_2d(x, embed))

    # Correctness check against the plain-JAX reference (x + embed broadcast).
    ref = x + embed
    assert out.shape == (B, H, W, D)
    assert jnp.allclose(out, ref, atol=1e-6, rtol=1e-6)

    # Also exercise the interpolation branch (different spatial size).
    x2 = jax.random.normal(kx, (B, 8, 8, D), dtype=jnp.float32)
    out2 = jax.block_until_ready(vit_pos_embed_2d(x2, embed))
    assert out2.shape == (B, 8, 8, D)

    print("KERNEL_OK")
</pallas_src>

<mosaic_0001>
module attributes {stable_mosaic.version = 11 : i64} {
  func.func @_add_pos_kernel(%arg0: i32, %arg1: i32, %arg2: memref<1x8x1024xf32, #tpu.memory_space<vmem>>, %arg3: memref<1x8x1024xf32, #tpu.memory_space<vmem>>, %arg4: memref<1x8x1024xf32, #tpu.memory_space<vmem>>) attributes {dimension_semantics = [#tpu.dimension_semantics<parallel>, #tpu.dimension_semantics<parallel>], iteration_bounds = array<i64: 1, 2>, scalar_prefetch = 0 : i64, scratch_operands = 0 : i64, tpu.core_type = #tpu.core_type<tc>, window_params = [{transform_indices = @transform_0, window_bounds = array<i64: 1, 8, 1024>}, {transform_indices = @transform_1, window_bounds = array<i64: 1, 8, 1024>}, {transform_indices = @transform_2, window_bounds = array<i64: 1, 8, 1024>}]} {
    %c0 = arith.constant 0 : index
    %c0_0 = arith.constant 0 : index
    %c0_1 = arith.constant 0 : index
    %0 = vector.load %arg2[%c0, %c0_0, %c0_1] : memref<1x8x1024xf32, #tpu.memory_space<vmem>>, vector<1x8x1024xf32>
    %c0_2 = arith.constant 0 : index
    %c0_3 = arith.constant 0 : index
    %c0_4 = arith.constant 0 : index
    %1 = vector.load %arg3[%c0_2, %c0_3, %c0_4] : memref<1x8x1024xf32, #tpu.memory_space<vmem>>, vector<1x8x1024xf32>
    %2 = arith.addf %0, %1 : vector<1x8x1024xf32>
    %c0_5 = arith.constant 0 : index
    %c0_6 = arith.constant 0 : index
    %c0_7 = arith.constant 0 : index
    %3 = vector.load %arg4[%c0_5, %c0_6, %c0_7] : memref<1x8x1024xf32, #tpu.memory_space<vmem>>, vector<1x8x1024xf32>
    tpu.vector_store %arg4[%c0_5, %c0_6, %c0_7], %2 {strides = array<i32>} : memref<1x8x1024xf32, #tpu.memory_space<vmem>>, vector<1x8x1024xf32>,
    return
  }
  func.func @transform_0(%arg0: i32, %arg1: i32) -> (i32, i32, i32) {
    %c0_i32 = arith.constant 0 : i32
    %c0_i32_0 = arith.constant 0 : i32
    return %arg1, %arg0, %c0_i32 : i32, i32, i32
  }
  func.func @transform_1(%arg0: i32, %arg1: i32) -> (i32, i32, i32) {
    %c0_i32 = arith.constant 0 : i32
    %c0_i32_0 = arith.constant 0 : i32
    %c0_i32_1 = arith.constant 0 : i32
    return %c0_i32, %arg0, %c0_i32_0 : i32, i32, i32
  }
  func.func @transform_2(%arg0: i32, %arg1: i32) -> (i32, i32, i32) {
    %c0_i32 = arith.constant 0 : i32
    %c0_i32_0 = arith.constant 0 : i32
    return %arg1, %arg0, %c0_i32 : i32, i32, i32
  }
}

</mosaic_0001>

<bundles_post_ra>
// kernel: tpu_custom_call.1
= control target key start
LH: loop header
LB: loop body
LE: loop exit
PB: predicated region body
PF: predicated region fallthrough
CT: control target
= control target key end

     0   :  { %7 = vsyncpa [#allocation3], 0  ;;  %s826_s0 = inlined_call_operand.hbm [shape: f32[2,8,1024], index: 0, kind: input, shape index: {}]   ;;  %s827_s1 = inlined_call_operand.hbm [shape: f32[1,8,1024], index: 1, kind: input, shape index: {}]   ;;  %s828_s2 = inlined_call_operand.hbm [shape: f32[2,8,1024], index: 2, kind: output, shape index: {}]  }
   0x1   :  { %9 = vsyncpa [#allocation3 + $0x1], 0 }
   0x2   :  { %10 = vsyncpa [#allocation6], 0 }
   0x3   :  { %11 = vsyncpa [#allocation4], 0 }
   0x4   :  { %13 = vsyncpa [#allocation4 + $0x1], 0  ;;  %s600_s9 = smov 0   ;;  %s602_s10 = smov 0  }
   0x5   :  { %s604_s11 = smov 0   ;;  %s606_s12 = smov 0  }
   0x6   :  { %s608_s13 = smov 0   ;;  %s610_s14 = smov 0  }
   0x7 LB: > { %s344_s15 = sadd.s32 4294967295, %s580_s14   ;;  %s345_s16 = sadd.s32 4294967294, %s580_s14   ;;  %s580_s14 = sphi %s610_s14, %s19_s14   ;;  %s576_s13 = sphi %s608_s13, %s853_s13   ;;  %s572_s12 = sphi %s606_s12, %s852_s12   ;;  %s568_s11 = sphi %s604_s11, %s851_s11   ;;  %s564_s10 = sphi %s602_s10, %s850_s10   ;;  %s560_s9 = sphi %s600_s9, %s849_s9  }
   0x8   : > { %p53_p0 = scmp.ne.s32.totalorder %s564_s10, %s560_s9  ;;  %p634_p1 = scmp.eq.s32.totalorder %s344_s15, 0 }
   0x9   : > { %p638_p2 = scmp.eq.s32.totalorder %s344_s15, 1  ;;  %p111_p3 = scmp.eq.s32.totalorder %s345_s16, 1 }
   0xa   : > { %s833_s17 = scalar_select %p634_p1, 1, 0 }
   0xb   : > { %s834_s18 = scalar_select %p638_p2, 1, 0 }
   0xc   : > { %p644_p4 = por %p634_p1, %p53_p0  ;;  %p346_p5 = scmp.ge.s32.totalorder %s580_s14, 1 }
   0xd   : > { %p649_p6 = por %p111_p3, %p53_p0  ;;  %p118_p7 = scmp.lt.s32.totalorder %s580_s14, 3 }
   0xe   : > { %s835_s19 = scalar_select %p644_p4, 1, 0 }
   0xf   : > { %s836_s20 = scalar_select %p649_p6, 1, 0 }
  0x10   : > { %p654_p8 = pnand %p346_p5, %p118_p7  ;;  %s582_s22 = smov [#allocation5]  }
  0x11   : > { %s134_s23 = sshll.u32 %s582_s22, 4  ;;  %s28_s25 = sadd.s32 1, %s576_s13  ;;  %s135_s23 = int_to_ptr.vmem [resolvable:$true] %s134_s23 }
  0x12   : > { %s837_s21 = scalar_select %p654_p8, 1, 0 }
  0x13   : > { %p371_p10 = pneg %p654_p8  ;;  %s40_s26 = sadd.s32 1, %s568_s11 }
  0x14   : > { %p669_p12 = scmp.ge.s32.totalorder %s28_s25, 2  ;;  %s436_s30 = scalar_lea.hbm %s827_s1, 1024 }
  0x15   : > { %p663_p11 = pnand %p371_p10, %p634_p1  ;;  %p437_p13 = scmp.ne.s32.totalorder %s827_s1, %s436_s30 }
  0x16   : > { %s839_s27 = scalar_select %p669_p12, 1, 0 }
  0x17   : > { %p438_p0 = pneg %p663_p11  ;;  %p443_p7 = scmp.lt.u32.totalorder %s436_s30, %s827_s1 }
  0x19   : > { %p439_p3 = pnand %p438_p0, %p437_p13 }
  0x1b   : > { %p440_p5 = pneg %p439_p3 }
  0x1d   : > { %p445_p10 = pnand %p443_p7, %p440_p5 }
  0x1f   : > { %448 = shalt.err (!%p445_p10)
}
  0x20   : > { %s449_s7 = scalar_lea.vmem %s135_s23, 1024  ;;  %p457_p4 = scmp.lt.s32.totalorder %s135_s23, %s135_s23 }
  0x21   : > { %p450_p9 = scmp.ne.s32.totalorder %s135_s23, %s449_s7  ;;  %p458_p8 = scmp.lt.s32.totalorder %s449_s7, %s449_s7 }
  0x23   : > { %p452_p6 = pnand %p450_p9, %p438_p0  ;;  %p459_p2 = por %p458_p8, %p457_p4 }
  0x25   : > { %p453_p1 = pneg %p452_p6 }
  0x27   : > { %p460_p12 = pnand %p459_p2, %p453_p1 }
  0x29   : > { %463 = shalt.err (!%p460_p12)
}
  0x2a   : > { %374 = dma.hbm_to_vmem [thread:$0]  (!%p663_p11), %s827_s1, 1024, %s135_s23, [#allocation6]  }
  0x2b   : > { %p840_p4 = scmp.ne.s32.totalorder %s839_s27, 0  ;;  %p47_p1 = scmp.ne.s32.totalorder %s568_s11, %s564_s10 }
  0x2c   : > { %p48_p2 = scmp.eq.s32.totalorder %s580_s14, 0  ;;  %p384_p6 = scmp.lt.s32.totalorder %s580_s14, 2 }
  0x2d   : > { %s855_s25 = smov (%p840_p4, %s28_s25), 0  ;;  %p841_p12 = scmp.ne.s32.totalorder %s834_s18, 0 }
  0x2e   : > { %s35_s16 = ssub.s32 %s576_s13, %s855_s25  ;;  %p49_p9 = por %p48_p2, %p47_p1 }
  0x2f   : > { %p38_p8 = scmp.eq.s32.totalorder %s35_s16, 0  ;;  %p701_p13 = por %p841_p12, %p47_p1 }
  0x30   : > { %s145_s24 = sand.u32 1, %s568_s11   ;;  %s361_s27 = sshll.u32 %s576_s13, 10 }
  0x31   : > { %s709_s28 = scalar_select %p38_p8, %s568_s11, %s40_s26  }
  0x32   : > { %s349_s23 = sshll.u32 %s145_s24, 6  ;;  %s715_s3 = scalar_lea.hbm %s826_s0, %s361_s27 }
  0x33   : > { %s149_s18 = scalar_lea.vmem [#allocation2], %s349_s23  ;;  %p719_p11 = pnand %p384_p6, %p49_p9 }
  0x34   : > { %s159_s4 = sshll.u32 %s149_s18, 4  ;;  %s146_s26 = scalar_lea.sflag [#allocation3], %s145_s24  ;;  %s717_s4 = int_to_ptr.vmem [resolvable:$true] %s159_s4 }
  0x35   : > { %s464_s6 = scalar_lea.hbm %s715_s3, 1024  ;;  %p466_p3 = pneg %p719_p11 }
  0x36   : > { %p465_p0 = scmp.ne.s32.totalorder %s715_s3, %s464_s6  ;;  %s469_s15 = scalar_lea.hbm %s826_s0, 2048 }
  0x37   : > { %p470_p10 = scmp.lt.u32.totalorder %s715_s3, %s826_s0  ;;  %p471_p4 = scmp.lt.u32.totalorder %s469_s15, %s464_s6 }
  0x38   : > { %p467_p5 = pnand %p466_p3, %p465_p0  ;;  %p473_p2 = scmp.lt.u32.totalorder %s464_s6, %s715_s3 }
  0x39   : > { %p472_p1 = por %p471_p4, %p470_p10 }
  0x3a   : > { %p468_p7 = pneg %p467_p5 }
  0x3b   : > { %p474_p6 = por %p473_p2, %p472_p1 }
  0x3d   : > { %p475_p8 = pnand %p474_p6, %p468_p7 }
  0x3f   : > { %478 = shalt.err (!%p475_p8)
}
  0x40   : > { %s479_s24 = scalar_lea.vmem %s717_s4, 1024  ;;  %s583_s27 = smov [#allocation2]  }
  0x41   : > { %p480_p9 = scmp.ne.s32.totalorder %s717_s4, %s479_s24  ;;  %s484_s29 = sshll.u32 %s583_s27, 4  ;;  %s485_s29 = int_to_ptr.vmem [resolvable:$false] %s484_s29 }
  0x42   : > { %s486_s30 = scalar_lea.vmem %s485_s29, 2048  ;;  %p487_p5 = scmp.lt.s32.totalorder %s717_s4, %s485_s29 }
  0x43   : > { %p482_p12 = pnand %p480_p9, %p466_p3  ;;  %p488_p10 = scmp.lt.s32.totalorder %s486_s30, %s479_s24 }
  0x45   : > { %p483_p0 = pneg %p482_p12  ;;  %p489_p4 = por %p488_p10, %p487_p5 }
  0x47   : > { %p490_p1 = pnand %p489_p4, %p483_p0 }
  0x49   : > { %493 = shalt.err (!%p490_p1)
}
  0x4a   : > { %378 = dma.hbm_to_vmem [thread:$0]  (!%p719_p11), %s715_s3, 1024, %s717_s4, %s146_s26  }
  0x4b   : > { %p844_p7 = scmp.ne.s32.totalorder %s837_s21, 0 }
  0x4c   : > { %s751_s18 = sand.u32 (!%p844_p7), 1, %s564_s10   ;;  %p845_p3 = scmp.ne.s32.totalorder (!%p844_p7), %s835_s19, 0 }
  0x4d   : > { %168 = sbr.rel (%p844_p7) target bundleno = 113 (0x71), region = 28  ;;  %s353_s6 = sshll.u32 (!%p844_p7), %s751_s18, 6 }
  0x4e   : > { %s171_s7 = scalar_lea.sflag (!%p844_p7), [#allocation3], %s751_s18  ;;  %s755_s8 = scalar_lea.vmem (!%p844_p7), [#allocation2], %s353_s6 }
  0x54   : > { %547 = dma.done.wait (%p845_p3), %s171_s7, 1024  }
  0x55   : > { %549 = vsyncadd (%p845_p3), %s171_s7, 4294966272  ;;  %p846_p11 = scmp.ne.s32.totalorder %s833_s17, 0 }
  0x57   : > { %551 = dma.done.wait (%p846_p11), [#allocation6], 1024  }
  0x58   : > { %553 = vsyncadd (%p846_p11), [#allocation6], 4294966272  ;;  %v199_v0 = vld [vmem:[%s755_s8] sm:$0xff]  ;;  %v200_v2 = vld [vmem:[%s755_s8 + $0x8] sm:$0xff]  ;;  %s198_s17 = scalar_lea.vmem [#allocation7], %s353_s6  ;;  %s362_s19 = sshll.u32 %s572_s12, 10 }
  0x59   : > { %v207_v1 = vld [vmem:[#allocation5] sm:$0xff]  ;;  %v208_v4 = vld [vmem:[#allocation5 + $0x8] sm:$0xff]  ;;  %v201_v5 = vld [vmem:[%s755_s8 + $0x10] sm:$0xff]  ;;  %s248_s21 = sshll.u32 %s198_s17, 4  ;;  %s777_s12 = scalar_lea.hbm %s828_s2, %s362_s19  ;;  %s779_s21 = int_to_ptr.vmem [resolvable:$true] %s248_s21 }
  0x5a   : > { %v215_v3 = vadd.f32 %v207_v1, %v199_v0  ;;  %v209_v6 = vld [vmem:[#allocation5 + $0x10] sm:$0xff]  ;;  %v216_v7 = vadd.f32 %v208_v4, %v200_v2  ;;  %v202_v9 = vld [vmem:[%s755_s8 + $0x18] sm:$0xff]  ;;  %v203_v11 = vld [vmem:[%s755_s8 + $0x20] sm:$0xff]  ;;  %s232_s5 = scalar_lea.sflag [#allocation4], %s751_s18  ;;  %s494_s26 = scalar_lea.vmem %s779_s21, 1024 }
  0x5b   : > { %v217_v8 = vadd.f32 %v209_v6, %v201_v5  ;;  %v210_v10 = vld [vmem:[#allocation5 + $0x18] sm:$0xff]  ;;  %v211_v13 = vld [vmem:[#allocation5 + $0x20] sm:$0xff]  ;;  %v204_v14 = vld [vmem:[%s755_s8 + $0x28] sm:$0xff]  ;;  %p495_p2 = scmp.ne.s32.totalorder %s779_s21, %s494_s26  ;;  %s584_s15 = smov [#allocation7]  }
  0x5c   : > { %223 = vst [vmem:[%s198_s17] sm:$0xff] %v215_v3  ;;  %v218_v12 = vadd.f32 %v210_v10, %v202_v9  ;;  %v212_v15 = vld [vmem:[#allocation5 + $0x28] sm:$0xff]  ;;  %224 = vst [vmem:[%s198_s17 + $0x8] sm:$0xff] %v216_v7  ;;  %v219_v16 = vadd.f32 %v211_v13, %v203_v11  ;;  %v205_v18 = vld [vmem:[%s755_s8 + $0x30] sm:$0xff]  ;;  %s498_s16 = sshll.u32 %s584_s15, 4  ;;  %s499_s16 = int_to_ptr.vmem [resolvable:$false] %s498_s16 }
  0x5d   : > { %225 = vst [vmem:[%s198_s17 + $0x10] sm:$0xff] %v217_v8  ;;  %v220_v17 = vadd.f32 %v212_v15, %v204_v14  ;;  %v213_v19 = vld [vmem:[#allocation5 + $0x30] sm:$0xff]  ;;  %v206_v20 = vld [vmem:[%s755_s8 + $0x38] sm:$0xff]  ;;  %p496_p6 = pnand %p495_p2, %p701_p13  ;;  %s500_s23 = scalar_lea.vmem %s499_s16, 2048 }
  0x5e   : > { %226 = vst [vmem:[%s198_s17 + $0x18] sm:$0xff] %v218_v12  ;;  %v221_v21 = vadd.f32 %v213_v19, %v205_v18  ;;  %v214_v22 = vld [vmem:[#allocation5 + $0x38] sm:$0xff]  ;;  %227 = vst [vmem:[%s198_s17 + $0x20] sm:$0xff] %v219_v16  ;;  %p501_p9 = scmp.lt.s32.totalorder %s779_s21, %s499_s16  ;;  %p502_p12 = scmp.lt.s32.totalorder %s500_s23, %s494_s26 }
  0x5f   : > { %228 = vst [vmem:[%s198_s17 + $0x28] sm:$0xff] %v220_v17  ;;  %v222_v23 = vadd.f32 %v214_v22, %v206_v20  ;;  %p497_p8 = pneg %p496_p6 }
  0x60   : > { %229 = vst [vmem:[%s198_s17 + $0x30] sm:$0xff] %v221_v21  ;;  %p503_p0 = por %p502_p12, %p501_p9 }
  0x61   : > { %230 = vst [vmem:[%s198_s17 + $0x38] sm:$0xff] %v222_v23 }
  0x62   : > { %p504_p5 = pnand %p503_p0, %p497_p8 }
  0x64   : > { %507 = shalt.err (!%p504_p5)
}
  0x65   : > { %s508_s24 = scalar_lea.hbm %s777_s12, 1024  ;;  %s512_s30 = scalar_lea.hbm %s828_s2, 2048 }
  0x66   : > { %p509_p10 = scmp.ne.s32.totalorder %s777_s12, %s508_s24  ;;  %p513_p7 = scmp.lt.u32.totalorder %s777_s12, %s828_s2 }
  0x67   : > { %p514_p3 = scmp.lt.u32.totalorder %s512_s30, %s508_s24  ;;  %p516_p2 = scmp.lt.u32.totalorder %s508_s24, %s777_s12 }
  0x68   : > { %p510_p4 = pnand %p509_p10, %p701_p13 }
  0x69   : > { %p515_p11 = por %p514_p3, %p513_p7 }
  0x6a   : > { %p511_p1 = pneg %p510_p4 }
  0x6b   : > { %p517_p6 = por %p516_p2, %p515_p11 }
  0x6d   : > { %p518_p8 = pnand %p517_p6, %p511_p1 }
  0x6f   : > { %521 = shalt.err (!%p518_p8)
}
  0x70   : > { %369 = dma.vmem_to_hbm [thread:$0]  (%p701_p13), %s779_s21, 1024, %s777_s12, %s232_s5  }
  0x71 PF: > { %s260_s7 = sand.u32 1, %s560_s9   ;;  %p847_p9 = scmp.ne.s32.totalorder %s836_s20, 0 }
  0x72   : > { %p848_p12 = scmp.ge.s32.totalorder %s580_s14, 2  ;;  %s261_s8 = scalar_lea.sflag [#allocation4], %s260_s7 }
  0x74   : > { %p380_p0 = pnand %p848_p12, %p847_p9 }
  0x76   : > { %555 = dma.done.wait (!%p380_p0), %s261_s8, 1024  }
  0x77   : > { %557 = vsyncadd (!%p380_p0), %s261_s8, 4294966272  ;;  %s19_s14 = sadd.s32 1, %s580_s14   ;;  %s849_s9 = smov %s564_s10 }
  0x78   : > { %p16_p5 = scmp.ge.s32.totalorder %s19_s14, 4   ;;  %s850_s10 = smov %s568_s11 }
  0x79   : > { %s851_s11 = smov %s709_s28  ;;  %s852_s12 = smov %s576_s13 }
  0x7a   : > { %s853_s13 = smov %s855_s25  ;;  %18 = sbr.rel (!%p16_p5) target bundleno = 7 (0x7), region = 78 }
  0x81   :  { %266 = vsyncpa [#allocation3], 1 }
  0x82   :  { %268 = vsyncpa [#allocation3 + $0x1], 1 }
  0x83   :  { %269 = vsyncpa [#allocation6], 1 }
  0x84   :  { %270 = vsyncpa [#allocation4], 1 }
  0x85   :  { %272 = vsyncpa [#allocation4 + $0x1], 1 }

</bundles_post_ra>
